<compile_context>
chip_gen: v7x
topology: tpu7x:2x2x1
jax: 0.10.0
libtpu: 0.0.40
codegen_flags: <defaults>
</compile_context>

<pallas_src>
import jax
import jax.numpy as jnp
from jax.experimental import pallas as pl
from jax.experimental.pallas import tpu as pltpu

LANE = 128
SUBLANE = 8
VMEM_BUDGET = 36 << 20          # conservative: fits v7x (64 MiB) with headroom


def _round_up(x, m):
    return (x + m - 1) // m * m


# --------------------------------------------------------------------------- #
# Kernel
# --------------------------------------------------------------------------- #
def _fused_proj_kernel(x_ref, w_ref, b_ref, mask_ref, out_ref):
    # Single fused Linear for both heads on the MXU (native-dtype operands,
    # f32 accumulation).
    y = jnp.dot(x_ref[...], w_ref[...], preferred_element_type=jnp.float32)
    y = y + b_ref[...].astype(jnp.float32)
    # Numerically stable softplus in f32 (EUP slot), selected by the resident
    # column mask; identity on "loc" + padding columns.
    sp = jnp.maximum(y, 0.0) + jnp.log1p(jnp.exp(-jnp.abs(y)))
    out = jnp.where(mask_ref[...] != 0.0, sp, y)
    out_ref[...] = out.astype(out_ref.dtype)


# --------------------------------------------------------------------------- #
# One-time parameter preparation (hoisted OUT of the per-call forward path)
# --------------------------------------------------------------------------- #
def prepare_fused_params(params, out_features, args_dim, *, dtype=None):
    """Fuse both projection heads into one padded weight/bias (+ softplus mask).

    Call once at model-init time and reuse the result for every forward; this
    keeps the reshape/transpose/pad passes over the weights off the hot path.
    """
    w_loc, b_loc = params["loc"]
    w_scale, b_scale = params["scale"]
    dim_loc, dim_scale = args_dim["loc"], args_dim["scale"]
    if dtype is None:
        dtype = w_loc.dtype
    K = w_loc.shape[0]
    n_loc = dim_loc * out_features
    n_scale = dim_scale * out_features
    n_fused = n_loc + n_scale
    n_pad = _round_up(n_fused, LANE)

    def reorder(w, b, dim):
        # PyTorch flattened columns follow (dim, out) order (implied by the
        # rearrange '... (dim out) -> ... out dim').  Permute once to
        # (out, dim) order so the post-kernel step is a pure reshape.
        w = w.reshape(K, dim, out_features).transpose(0, 2, 1)
        w = w.reshape(K, dim * out_features)
        b = b.reshape(dim, out_features).T.reshape(dim * out_features)
        return w, b

    w_loc, b_loc = reorder(w_loc, b_loc, dim_loc)
    w_scale, b_scale = reorder(w_scale, b_scale, dim_scale)

    w = (jnp.zeros((K, n_pad), dtype)
         .at[:, :n_loc].set(w_loc.astype(dtype))
         .at[:, n_loc:n_fused].set(w_scale.astype(dtype)))
    b = (jnp.zeros((1, n_pad), dtype)
         .at[0, :n_loc].set(b_loc.astype(dtype))
         .at[0, n_loc:n_fused].set(b_scale.astype(dtype)))
    mask = jnp.zeros((1, n_pad), jnp.float32).at[0, n_loc:n_fused].set(1.0)

    meta = dict(in_features=K, out_features=out_features,
                dim_loc=dim_loc, dim_scale=dim_scale,
                n_loc=n_loc, n_scale=n_scale, n_fused=n_fused, n_pad=n_pad)
    return (w, b, mask), meta


# --------------------------------------------------------------------------- #
# Row-tile selection
# --------------------------------------------------------------------------- #
def _pick_tm(M, K, n_pad, bytes_in, bytes_out):
    # Resident (single-buffered) operands: fused weight + bias + mask.
    resident = K * n_pad * bytes_in + n_pad * bytes_in + n_pad * 4
    tm = min(2048, _round_up(max(M, 1), SUBLANE))
    # >= 2 row blocks so the "parallel" axis can shard across v7x's two TCs.
    if M >= 2 * SUBLANE:
        tm = min(tm, _round_up(pl.cdiv(M, 2), SUBLANE))
    # Shrink until double-buffered x/out tiles + resident weights fit VMEM.
    per_row = K * bytes_in + n_pad * bytes_out
    while tm > SUBLANE and resident + 2 * tm * per_row > VMEM_BUDGET:
        tm = max(SUBLANE, _round_up(tm // 2, SUBLANE))
    # TODO(synk): for in_features so large that even TM=8 overflows the budget,
    # add a K grid axis ("arbitrary") with an f32 VMEM accumulator scratch.
    return tm


# --------------------------------------------------------------------------- #
# Forward
# --------------------------------------------------------------------------- #
def distr_param_proj(x, fused_params, meta):
    """x: (..., in_features) -> {"loc": (..., out, dim_loc),
                                 "scale": (..., out, dim_scale)}"""
    w, b, mask = fused_params
    *batch, K = x.shape
    assert K == meta["in_features"]
    M = 1
    for s in batch:
        M *= s

    n_loc, n_fused, n_pad = meta["n_loc"], meta["n_fused"], meta["n_pad"]
    out_features = meta["out_features"]
    dim_loc, dim_scale = meta["dim_loc"], meta["dim_scale"]

    compute_dtype = w.dtype
    out_dtype = x.dtype

    x2 = x.reshape(M, K)                      # no pad, no up-cast
    if x2.dtype != compute_dtype:
        x2 = x2.astype(compute_dtype)

    bytes_in = jnp.dtype(compute_dtype).itemsize
    bytes_out = jnp.dtype(out_dtype).itemsize
    TM = _pick_tm(M, K, n_pad, bytes_in, bytes_out)
    grid = (pl.cdiv(M, TM),)

    # VMEM need already includes the depth-2 buffers on x/out; do NOT double it.
    need = (K * n_pad * bytes_in + n_pad * bytes_in + n_pad * 4
            + 2 * TM * (K * bytes_in + n_pad * bytes_out))
    vmem_limit = int(min(max(need + (4 << 20), 8 << 20), 44 << 20))

    resident = dict(pipeline_mode=pl.Buffered(buffer_count=1))
    y = pl.pallas_call(
        _fused_proj_kernel,
        grid=grid,
        in_specs=[
            pl.BlockSpec((TM, K), lambda i: (i, 0)),                    # streamed rows
            pl.BlockSpec((K, n_pad), lambda i: (0, 0), **resident),     # resident weight
            pl.BlockSpec((1, n_pad), lambda i: (0, 0), **resident),     # resident bias
            pl.BlockSpec((1, n_pad), lambda i: (0, 0), **resident),     # resident mask
        ],
        out_specs=pl.BlockSpec((TM, n_pad), lambda i: (i, 0)),
        out_shape=jax.ShapeDtypeStruct((M, n_pad), out_dtype),
        compiler_params=pltpu.CompilerParams(
            dimension_semantics=("parallel",),
            vmem_limit_bytes=vmem_limit),
    )(x2, w, b, mask)

    # Columns are already in (out, dim) order -> pure reshapes.
    # (A narrow n_fused-wide / split-output variant trades lane-dense stores
    #  for 8x less output DMA on tiny-K shapes; kept lane-dense here.)
    loc = y[:, :n_loc].reshape(*batch, out_features, dim_loc)
    scale = y[:, n_loc:n_fused].reshape(*batch, out_features, dim_scale)
    return {"loc": loc, "scale": scale}


# --------------------------------------------------------------------------- #
# Pure-JAX reference (mirrors the PyTorch forward)
# --------------------------------------------------------------------------- #
def _reference(x, params, out_features, args_dim):
    def head(w, b, dim, fn):
        y = x @ w + b
        y = y.reshape(*x.shape[:-1], dim, out_features)
        y = jnp.swapaxes(y, -1, -2)          # '... (dim out) -> ... out dim'
        return fn(y)

    softplus = lambda v: jnp.maximum(v, 0.0) + jnp.log1p(jnp.exp(-jnp.abs(v)))
    return {
        "loc": head(*params["loc"], args_dim["loc"], lambda v: v),
        "scale": head(*params["scale"], args_dim["scale"], softplus),
    }


def _init_linear(key, in_features, n_out):
    # deterministic synthetic init (PyTorch-Linear-like uniform bound)
    kw, kb = jax.random.split(key)
    bound = 1.0 / jnp.sqrt(in_features)
    w = jax.random.uniform(kw, (in_features, n_out), jnp.float32, -bound, bound)
    b = jax.random.uniform(kb, (n_out,), jnp.float32, -bound, bound)
    return w, b


if __name__ == "__main__":
    batch, seq = 2, 8
    in_features = 32
    out_features = 8                       # "out_size" in the rearrange
    args_dim = {"loc": 1, "scale": 1}      # e.g. Normal distribution params

    key = jax.random.PRNGKey(0)
    kx, kl, ks = jax.random.split(key, 3)

    x = jax.random.normal(kx, (batch, seq, in_features), jnp.float32)
    params = {
        "loc": _init_linear(kl, in_features, args_dim["loc"] * out_features),
        "scale": _init_linear(ks, in_features, args_dim["scale"] * out_features),
    }

    # ---- f32 path (matches the PyTorch default dtype exactly) ----
    fused, meta = prepare_fused_params(params, out_features, args_dim)
    out = distr_param_proj(x, fused, meta)
    jax.block_until_ready(out)

    assert out["loc"].shape == (batch, seq, out_features, args_dim["loc"])
    assert out["scale"].shape == (batch, seq, out_features, args_dim["scale"])
    assert out["loc"].dtype == x.dtype
    assert bool(jnp.all(out["scale"] > 0.0))   # softplus domain map -> positive

    ref = _reference(x, params, out_features, args_dim)
    assert bool(jnp.allclose(out["loc"], ref["loc"], atol=1e-5, rtol=1e-5))
    assert bool(jnp.allclose(out["scale"], ref["scale"], atol=1e-5, rtol=1e-5))

    # ---- bf16 streaming path (halves HBM traffic; math stays f32 in-kernel) ----
    x_bf = x.astype(jnp.bfloat16)
    fused_bf, meta_bf = prepare_fused_params(params, out_features, args_dim,
                                             dtype=jnp.bfloat16)
    out_bf = distr_param_proj(x_bf, fused_bf, meta_bf)
    jax.block_until_ready(out_bf)
    assert out_bf["loc"].dtype == jnp.bfloat16
    params_bf = {k: (w.astype(jnp.bfloat16).astype(jnp.float32),
                     b.astype(jnp.bfloat16).astype(jnp.float32))
                 for k, (w, b) in params.items()}
    ref_bf = _reference(x_bf.astype(jnp.float32), params_bf, out_features, args_dim)
    assert bool(jnp.allclose(out_bf["loc"].astype(jnp.float32),
                             ref_bf["loc"], atol=2e-2, rtol=2e-2))
    assert bool(jnp.allclose(out_bf["scale"].astype(jnp.float32),
                             ref_bf["scale"], atol=2e-2, rtol=2e-2))

    print("KERNEL_OK")
</pallas_src>

<mosaic_0001>
module attributes {stable_mosaic.version = 11 : i64} {
  func.func @_fused_proj_kernel(%arg0: i32, %arg1: memref<8x32xf32, #tpu.memory_space<vmem>>, %arg2: memref<32x128xf32, #tpu.memory_space<vmem>>, %arg3: memref<1x128xf32, #tpu.memory_space<vmem>>, %arg4: memref<1x128xf32, #tpu.memory_space<vmem>>, %arg5: memref<8x128xf32, #tpu.memory_space<vmem>>) attributes {dimension_semantics = [#tpu.dimension_semantics<parallel>], iteration_bounds = array<i64: 2>, scalar_prefetch = 0 : i64, scratch_operands = 0 : i64, tpu.core_type = #tpu.core_type<tc>, window_params = [{transform_indices = @transform_0, window_bounds = array<i64: 8, 32>}, {pipeline_mode = #tpu.pipeline_mode<synchronous>, transform_indices = @transform_1, window_bounds = array<i64: 32, 128>}, {pipeline_mode = #tpu.pipeline_mode<synchronous>, transform_indices = @transform_2, window_bounds = array<i64: 1, 128>}, {pipeline_mode = #tpu.pipeline_mode<synchronous>, transform_indices = @transform_3, window_bounds = array<i64: 1, 128>}, {transform_indices = @transform_4, window_bounds = array<i64: 8, 128>}]} {
    %c0 = arith.constant 0 : index
    %c0_0 = arith.constant 0 : index
    %0 = vector.load %arg1[%c0, %c0_0] : memref<8x32xf32, #tpu.memory_space<vmem>>, vector<8x32xf32>
    %c0_1 = arith.constant 0 : index
    %c0_2 = arith.constant 0 : index
    %1 = vector.load %arg2[%c0_1, %c0_2] : memref<32x128xf32, #tpu.memory_space<vmem>>, vector<32x128xf32>
    %cst = arith.constant dense<0.000000e+00> : vector<8x128xf32>
    %2 = tpu.matmul %0, %1, %cst {dimension_numbers = #tpu.dot_dimension_numbers<[1], [0], [0], [1], [0, 0, 1, 1], [], []>} : vector<8x32xf32>, vector<32x128xf32>, vector<8x128xf32> -> vector<8x128xf32>
    %c0_3 = arith.constant 0 : index
    %c0_4 = arith.constant 0 : index
    %3 = vector.load %arg3[%c0_3, %c0_4] : memref<1x128xf32, #tpu.memory_space<vmem>>, vector<1x128xf32>
    %4 = vector.broadcast %3 : vector<1x128xf32> to vector<8x128xf32>
    %5 = arith.addf %2, %4 : vector<8x128xf32>
    %cst_5 = arith.constant 0.000000e+00 : f32
    %6 = vector.broadcast %cst_5 : f32 to vector<8x128xf32>
    %7 = arith.maximumf %5, %6 : vector<8x128xf32>
    %8 = math.absf %5 : vector<8x128xf32>
    %cst_6 = arith.constant 0.000000e+00 : f32
    %9 = vector.broadcast %cst_6 : f32 to vector<8x128xf32>
    %10 = arith.subf %9, %8 : vector<8x128xf32>
    %11 = math.exp %10 : vector<8x128xf32>
    %12 = math.log1p %11 : vector<8x128xf32>
    %13 = arith.addf %7, %12 : vector<8x128xf32>
    %c0_7 = arith.constant 0 : index
    %c0_8 = arith.constant 0 : index
    %14 = vector.load %arg4[%c0_7, %c0_8] : memref<1x128xf32, #tpu.memory_space<vmem>>, vector<1x128xf32>
    %cst_9 = arith.constant 0.000000e+00 : f32
    %15 = vector.broadcast %cst_9 : f32 to vector<1x128xf32>
    %16 = arith.cmpf one, %14, %15 : vector<1x128xf32>
    %17 = vector.shape_cast %16 : vector<1x128xi1> to vector<1x128xi1>
    %18 = vector.broadcast %17 : vector<1x128xi1> to vector<8x128xi1>
    %19 = arith.select %18, %13, %5 : vector<8x128xi1>, vector<8x128xf32>
    %c0_10 = arith.constant 0 : index
    %c0_11 = arith.constant 0 : index
    %20 = vector.load %arg5[%c0_10, %c0_11] : memref<8x128xf32, #tpu.memory_space<vmem>>, vector<8x128xf32>
    tpu.vector_store %arg5[%c0_10, %c0_11], %19 {strides = array<i32>} : memref<8x128xf32, #tpu.memory_space<vmem>>, vector<8x128xf32>,
    return
  }
  func.func @transform_0(%arg0: i32) -> (i32, i32) {
    %c0_i32 = arith.constant 0 : i32
    %c0_i32_0 = arith.constant 0 : i32
    return %arg0, %c0_i32 : i32, i32
  }
  func.func @transform_1(%arg0: i32) -> (i32, i32) {
    %c0_i32 = arith.constant 0 : i32
    %c0_i32_0 = arith.constant 0 : i32
    %c0_i32_1 = arith.constant 0 : i32
    return %c0_i32, %c0_i32_0 : i32, i32
  }
  func.func @transform_2(%arg0: i32) -> (i32, i32) {
    %c0_i32 = arith.constant 0 : i32
    %c0_i32_0 = arith.constant 0 : i32
    %c0_i32_1 = arith.constant 0 : i32
    return %c0_i32, %c0_i32_0 : i32, i32
  }
  func.func @transform_3(%arg0: i32) -> (i32, i32) {
    %c0_i32 = arith.constant 0 : i32
    %c0_i32_0 = arith.constant 0 : i32
    %c0_i32_1 = arith.constant 0 : i32
    return %c0_i32, %c0_i32_0 : i32, i32
  }
  func.func @transform_4(%arg0: i32) -> (i32, i32) {
    %c0_i32 = arith.constant 0 : i32
    %c0_i32_0 = arith.constant 0 : i32
    return %arg0, %c0_i32 : i32, i32
  }
}

</mosaic_0001>

<bundles_post_ra>
// kernel: tpu_custom_call.1
= control target key start
LH: loop header
LB: loop body
LE: loop exit
PB: predicated region body
PF: predicated region fallthrough
CT: control target
= control target key end

     0   :  { %9 = vsyncpa [#allocation3], 0  ;;  %s908_s0 = inlined_call_operand.hbm [shape: f32[16,32], index: 0, kind: input, shape index: {}]   ;;  %s909_s1 = inlined_call_operand.hbm [shape: f32[32,128], index: 1, kind: input, shape index: {}]   ;;  %s910_s2 = inlined_call_operand.vmem [shape: f32[1,128], index: 2, kind: input, shape index: {}]   ;;  %s911_s3 = inlined_call_operand.vmem [shape: f32[1,128], index: 3, kind: input, shape index: {}]   ;;  %s912_s4 = inlined_call_operand.hbm [shape: f32[16,128], index: 4, kind: output, shape index: {}]  }
   0x1   :  { %11 = vsyncpa [#allocation3 + $0x1], 0 }
   0x2   :  { %12 = vsyncpa [#allocation6], 0 }
   0x3   :  { %13 = vsyncpa [#allocation4], 0 }
   0x4   :  { %15 = vsyncpa [#allocation4 + $0x1], 0  ;;  %s702_s15 = smov 0   ;;  %s704_s16 = smov 0  }
   0x5   :  { %s706_s17 = smov 0   ;;  %s708_s18 = smov 0  }
   0x6 LB: > { %s723_s19 = sadd.s32 4294967295, %s666_s18   ;;  %s433_s20 = sadd.s32 4294967294, %s666_s18   ;;  %s666_s18 = sphi %s708_s18, %s932_s18   ;;  %s662_s17 = sphi %s706_s17, %s931_s17   ;;  %s658_s16 = sphi %s704_s16, %s930_s16   ;;  %s654_s15 = sphi %s702_s15, %s929_s15  }
   0x7   : > { %p41_p0 = scmp.ne.s32.totalorder %s658_s16, %s654_s15  ;;  %p913_p1 = scmp.eq.s32.totalorder %s723_s19, 0 }
   0x8   : > { %p134_p3 = scmp.eq.s32.totalorder %s433_s20, 1  ;;  %p434_p5 = scmp.ge.s32.totalorder %s666_s18, 1 }
   0x9   : > { %p732_p4 = por %p913_p1, %p41_p0  ;;  %p141_p7 = scmp.lt.s32.totalorder %s666_s18, 3 }
   0xa   : > { %p737_p6 = por %p134_p3, %p41_p0  ;;  %s668_s24 = smov [#allocation5]  }
   0xb   : > { %s916_s21 = scalar_select %p732_p4, 1, 0 }
   0xc   : > { %s917_s22 = scalar_select %p737_p6, 1, 0 }
   0xd   : > { %p742_p8 = pnand %p434_p5, %p141_p7  ;;  %s153_s25 = sshll.u32 %s668_s24, 4  ;;  %s746_s25 = int_to_ptr.vmem [resolvable:$true] %s153_s25 }
   0xe   : > { %s758_s27 = sadd.s32 1, %s666_s18   ;;  %s28_s28 = sadd.s32 1, %s662_s17 }
   0xf   : > { %s918_s23 = scalar_select %p742_p8, 1, 0 }
  0x10   : > { %p479_p9 = pneg %p742_p8  ;;  %s25_s29 = ssub.s32 %s666_s18, %s758_s27 }
  0x11   : > { %s538_s6 = scalar_lea.hbm %s909_s1, 512 }
  0x12   : > { %p753_p11 = pnand %p479_p9, %p913_p1  ;;  %p539_p12 = scmp.ne.s32.totalorder %s909_s1, %s538_s6 }
  0x13   : > { %p545_p5 = scmp.lt.u32.totalorder %s538_s6, %s909_s1 }
  0x14   : > { %p540_p13 = pneg %p753_p11 }
  0x16   : > { %p541_p0 = pnand %p540_p13, %p539_p12 }
  0x18   : > { %p542_p3 = pneg %p541_p0 }
  0x1a   : > { %p547_p7 = pnand %p545_p5, %p542_p3 }
  0x1c   : > { %550 = shalt.err (!%p547_p7)
}
  0x1d   : > { %s551_s11 = scalar_lea.vmem %s746_s25, 512  ;;  %p559_p2 = scmp.lt.s32.totalorder %s746_s25, %s746_s25 }
  0x1e   : > { %p552_p9 = scmp.ne.s32.totalorder %s746_s25, %s551_s11  ;;  %p560_p6 = scmp.lt.s32.totalorder %s551_s11, %s551_s11 }
  0x20   : > { %p554_p10 = pnand %p552_p9, %p540_p13  ;;  %p561_p4 = por %p560_p6, %p559_p2 }
  0x22   : > { %p555_p1 = pneg %p554_p10 }
  0x24   : > { %p562_p8 = pnand %p561_p4, %p555_p1 }
  0x26   : > { %565 = shalt.err (!%p562_p8)
}
  0x27   : > { %s669_s12 = smov 128   ;;  %s670_s13 = smov 8  }
  0x28   : > { %482 = dma.hbm_to_vmem [thread:$0]  (!%p753_p11), %s909_s1, 512, %s746_s25, [#allocation6], %s669_s12, %s669_s12, %s670_s13  }
  0x29   : > { %p26_p2 = scmp.eq.s32.totalorder %s25_s29, 0  ;;  %p35_p1 = scmp.ne.s32.totalorder %s662_s17, %s658_s16 }
  0x2a   : > { %p36_p4 = scmp.eq.s32.totalorder %s666_s18, 0  ;;  %p492_p6 = scmp.lt.s32.totalorder %s666_s18, 2 }
  0x2b   : > { %s789_s24 = scalar_select %p26_p2, %s662_s17, %s28_s28  }
  0x2c   : > { %p37_p8 = por %p36_p4, %p35_p1  ;;  %p920_p10 = scmp.eq.s32.totalorder %s723_s19, 1 }
  0x2d   : > { %s173_s5 = sand.u32 1, %s662_s17   ;;  %s438_s6 = sshll.u32 %s666_s18, 7 }
  0x2e   : > { %p793_p12 = por %p920_p10, %p35_p1  ;;  %s437_s7 = sshll.u32 %s173_s5, 3 }
  0x2f   : > { %s802_s9 = scalar_lea.hbm %s908_s0, %s438_s6  ;;  %s177_s25 = scalar_lea.vmem [#allocation2], %s437_s7 }
  0x30   : > { %s184_s28 = sshll.u32 %s177_s25, 4  ;;  %p804_p11 = pnand %p492_p6, %p37_p8  ;;  %s808_s28 = int_to_ptr.vmem [resolvable:$true] %s184_s28 }
  0x31   : > { %s174_s10 = scalar_lea.sflag [#allocation3], %s173_s5  ;;  %s566_s11 = scalar_lea.hbm %s802_s9, 128 }
  0x32   : > { %p567_p13 = scmp.ne.s32.totalorder %s802_s9, %s566_s11  ;;  %p568_p0 = pneg %p804_p11 }
  0x33   : > { %s571_s14 = scalar_lea.hbm %s908_s0, 256  ;;  %p572_p7 = scmp.lt.u32.totalorder %s802_s9, %s908_s0 }
  0x34   : > { %p569_p3 = pnand %p568_p0, %p567_p13  ;;  %p573_p9 = scmp.lt.u32.totalorder %s571_s14, %s566_s11 }
  0x35   : > { %p575_p1 = scmp.lt.u32.totalorder %s566_s11, %s802_s9 }
  0x36   : > { %p570_p5 = pneg %p569_p3  ;;  %p574_p2 = por %p573_p9, %p572_p7 }
  0x38   : > { %p576_p4 = por %p575_p1, %p574_p2 }
  0x3a   : > { %p577_p6 = pnand %p576_p4, %p570_p5 }
  0x3c   : > { %580 = shalt.err (!%p577_p6)
}
  0x3d   : > { %s581_s5 = scalar_lea.vmem %s808_s28, 128  ;;  %s671_s7 = smov [#allocation2]  }
  0x3e   : > { %p582_p8 = scmp.ne.s32.totalorder %s808_s28, %s581_s5  ;;  %s586_s26 = sshll.u32 %s671_s7, 4  ;;  %s587_s26 = int_to_ptr.vmem [resolvable:$false] %s586_s26 }
  0x3f   : > { %s588_s8 = scalar_lea.vmem %s587_s26, 256  ;;  %p589_p3 = scmp.lt.s32.totalorder %s808_s28, %s587_s26 }
  0x40   : > { %p584_p10 = pnand %p582_p8, %p568_p0  ;;  %p590_p7 = scmp.lt.s32.totalorder %s588_s8, %s581_s5 }
  0x42   : > { %p585_p13 = pneg %p584_p10  ;;  %p591_p9 = por %p590_p7, %p589_p3 }
  0x44   : > { %p592_p2 = pnand %p591_p9, %p585_p13 }
  0x46   : > { %595 = shalt.err (!%p592_p2)
}
  0x47   : > { %486 = dma.hbm_to_vmem [thread:$0]  (!%p804_p11), %s802_s9, 128, %s808_s28, %s174_s10  }
  0x48   : > { %p923_p5 = scmp.ne.s32.totalorder %s918_s23, 0 }
  0x49   : > { %s838_s25 = sand.u32 (!%p923_p5), 1, %s658_s16   ;;  %p924_p0 = scmp.ne.s32.totalorder (!%p923_p5), %s916_s21, 0 }
  0x4a   : > { %193 = sbr.rel (%p923_p5) target bundleno = 359 (0x167), region = 36  ;;  %s440_s11 = sshll.u32 (!%p923_p5), %s838_s25, 3 }
  0x4b   : > { %s196_s12 = scalar_lea.sflag (!%p923_p5), [#allocation3], %s838_s25  ;;  %s199_s13 = scalar_lea.vmem (!%p923_p5), [#allocation2], %s440_s11 }
  0x51   : > { %641 = dma.done.wait (%p924_p0), %s196_s12, 128  }
  0x52   : > { %643 = vsyncadd (%p924_p0), %s196_s12, 4294967168  ;;  %p925_p11 = scmp.eq.s32.totalorder %s723_s19, 0 }
  0x54   : > { %645 = dma.done.wait (%p925_p11), [#allocation6], 512   ;;  %p926_p1 = pmov %p925_p11 }
  0x55   : > { %v672_v0 = vmov 0.0|0.0   ;;  %vm673_vm0 = vmmov 0   ;;  %v674_v1 = vmov 0.0   ;;  %v229_v2 = vld [vmem:[#allocation5] sm:$0xff]  ;;  %v230_v3 = vld [vmem:[#allocation5 + $0x8] sm:$0xff]  ;;  %v231_v4 = vld [vmem:[#allocation5 + $0x10] sm:$0xff]  ;;  %v332_v17 = vlaneseq }
  0x56   : > { %647 = vsyncadd (%p926_p1), [#allocation6], 4294966784  ;;  %465 = vmatprep.subr.bf16.mxu0 %v672_v0  ;;  %462 = vmatprep.mubr.msk.f32.mxu0 %vm673_vm0, %v674_v1  ;;  %v466_v5 = vpack.c.bf16 %v230_v3, %v229_v2  ;;  %v232_v6 = vld [vmem:[#allocation5 + $0x18] sm:$0xff]  ;;  %vm240_vm1 = vcmask 261120   ;;  %v443_v9 = vld [vmem:[%s910_s2] ss:$0 sm:$0xff] }
  0x57   : > { %v469_v7 = vpack.c.bf16 %v232_v6, %v231_v4  ;;  %v228_v8 = vld [vmem:[%s199_s13] sm:$0xff]  ;;  %v333_v20 = vshrl.u32 %v332_v17, 7  ;;  %v675_v23 = vmov 0   ;;  %s446_s29 = sshll.u32 %s723_s19, 7  ;;  %s227_s10 = scalar_lea.vmem [#allocation7], %s440_s11 }
  0x58   : > { %467 = vmatpush3.bf16.msra.mxu0 %v466_v5  ;;  %v329_v19 = vld [vmem:[%s911_s3] sm:$0x1]  ;;  %s353_s14 = sshll.u32 %s227_s10, 4  ;;  %s864_s5 = scalar_lea.hbm %s912_s4, %s446_s29  ;;  %s866_s14 = int_to_ptr.vmem [resolvable:$true] %s353_s14 }
  0x59   : > { %468 = vmatprep.subr.bf16.mxu0 %v672_v0  ;;  %vm330_vm2 = vcmp.ne.f32.partialorder %v329_v19, 0.0  ;;  %v334_v22 = vsub.s32 0, %v333_v20  ;;  %s340_s7 = scalar_lea.sflag [#allocation4], %s838_s25  ;;  %s596_s19 = scalar_lea.vmem %s866_s14, 128 }
  0x5a   : > { %v331_v24 = vsel %vm330_vm2, 1, %v675_v23  ;;  %p597_p4 = scmp.ne.s32.totalorder %s866_s14, %s596_s19  ;;  %s676_s26 = smov [#allocation7]  }
  0x5b   : > { %v335_v27 = vrot.slane %v331_v24, %v334_v22  ;;  %s600_s8 = sshll.u32 %s676_s26, 4  ;;  %s601_s8 = int_to_ptr.vmem [resolvable:$false] %s600_s8 }
  0x5c   : > { %470 = vmatpush3.bf16.msra.mxu0 %v469_v7  ;;  %p598_p6 = pnand %p597_p4, %p793_p12  ;;  %s602_s11 = scalar_lea.vmem %s601_s8, 256 }
  0x5d   : > { %vm336_vm4 = vcmp.eq.s32.totalorder %v335_v27, 1  ;;  %p603_p10 = scmp.lt.s32.totalorder %s866_s14, %s601_s8  ;;  %p604_p13 = scmp.lt.s32.totalorder %s602_s11, %s596_s19 }
  0x5e   : > { %p599_p8 = pneg %p598_p6 }
  0x5f   : > { %463 = vmatmul.mubr.msk.f32.vlgmr.msra.gmra.mrb[0].mxu0 %vm240_vm1, %v228_v8  ;;  %p605_p3 = por %p604_p13, %p603_p10 }
  0x61   : > { %p606_p7 = pnand %p605_p3, %p599_p8 }
 0x132   : > { %v310_v10 = vpop.f32.mrb[0].mxu0 }
 0x133   : > { %v311_v11 = vadd.f32 %v443_v9, %v310_v10  ;;  %v464_v12 = vpop.f32.mrb[1].mxu0 }
 0x135   : > { %v315_v13 = vand.u32 2147483647, %v311_v11  ;;  %v314_v31 = vmax.f32 %v311_v11, 0.0 }
 0x137   : > { %v316_v14 = vsub.f32 0.0, %v315_v13 }
 0x139   : > { %v317_v15 = vmul.f32 1.442695, %v316_v14 }
 0x13b   : > { %534 = vpow2.f32 %v317_v15 }
 0x145   : > { %v535_v16 = vpop.eup %534 }
 0x146   : > { %v319_v18 = vadd.f32 1.0, %v535_v16  ;;  %v322_v21 = vmul.f32 -0.5, %v535_v16  ;;  %v325_v26 = vand.u32 2147483647, %v535_v16 }
 0x148   : > { %536 = vlog2.f32 %v319_v18  ;;  %v323_v25 = vadd.f32 1.0, %v322_v21  ;;  %vm326_vm3 = vcmp.lt.f32.partialorder %v325_v26, 0.0004427343 }
 0x14a   : > { %v324_v30 = vmul.f32 %v535_v16, %v323_v25 }
 0x152   : > { %v537_v28 = vpop.eup %536 }
 0x153   : > { %v321_v29 = vmul.f32 0.6931472, %v537_v28 }
 0x155   : > { %v327_v32 = vsel %vm326_vm3, %v324_v30, %v321_v29 }
 0x156   : > { %v328_v33 = vadd.f32 %v327_v32, %v314_v31 }
 0x158   : > { %v337_v34 = vsel %vm336_vm4, %v328_v33, %v311_v11 }
 0x159   : > { %338 = vst [vmem:[%s227_s10] sm:$0xff] %v337_v34 }
 0x15a   : > { %609 = shalt.err (!%p606_p7)
}
 0x15b   : > { %s610_s25 = scalar_lea.hbm %s864_s5, 128  ;;  %s614_s21 = scalar_lea.hbm %s912_s4, 256 }
 0x15c   : > { %p611_p9 = scmp.ne.s32.totalorder %s864_s5, %s610_s25  ;;  %p615_p0 = scmp.lt.u32.totalorder %s864_s5, %s912_s4 }
 0x15d   : > { %p616_p11 = scmp.lt.u32.totalorder %s614_s21, %s610_s25  ;;  %p618_p4 = scmp.lt.u32.totalorder %s610_s25, %s864_s5 }
 0x15e   : > { %p612_p2 = pnand %p611_p9, %p793_p12 }
 0x15f   : > { %p617_p1 = por %p616_p11, %p615_p0 }
 0x160   : > { %p613_p5 = pneg %p612_p2 }
 0x161   : > { %p619_p6 = por %p618_p4, %p617_p1 }
 0x163   : > { %p620_p8 = pnand %p619_p6, %p613_p5 }
 0x165   : > { %623 = shalt.err (!%p620_p8)
}
 0x166   : > { %477 = dma.vmem_to_hbm [thread:$0]  (%p793_p12), %s866_s14, 128, %s864_s5, %s340_s7  }
 0x167 PF: > { %s365_s28 = sand.u32 1, %s654_s15   ;;  %p927_p10 = scmp.ne.s32.totalorder %s917_s22, 0 }
 0x168   : > { %p928_p13 = scmp.ge.s32.totalorder %s666_s18, 2  ;;  %s366_s29 = scalar_lea.sflag [#allocation4], %s365_s28 }
 0x16a   : > { %p488_p3 = pnand %p928_p13, %p927_p10 }
 0x16c   : > { %649 = dma.done.wait (!%p488_p3), %s366_s29, 128  }
 0x16d   : > { %651 = vsyncadd (!%p488_p3), %s366_s29, 4294967168  ;;  %p18_p7 = scmp.ge.s32.totalorder %s758_s27, 4   ;;  %s929_s15 = smov %s658_s16 }
 0x16e   : > { %s930_s16 = smov %s662_s17  ;;  %s931_s17 = smov %s789_s24 }
 0x16f   : > { %s932_s18 = smov %s758_s27  ;;  %20 = sbr.rel (!%p18_p7) target bundleno = 6 (0x6), region = 85 }
 0x176   :  { %371 = vsyncpa [#allocation3], 1 }
 0x177   :  { %373 = vsyncpa [#allocation3 + $0x1], 1 }
 0x178   :  { %374 = vsyncpa [#allocation6], 1 }
 0x179   :  { %375 = vsyncpa [#allocation4], 1 }
 0x17a   :  { %377 = vsyncpa [#allocation4 + $0x1], 1 }

</bundles_post_ra>
